<compile_context>
chip_gen: v6e
topology: v6e:2x2x1
jax: 0.10.0
libtpu: 0.0.40
codegen_flags: <defaults>
</compile_context>

<pallas_src>
import math
import functools

import jax
import jax.numpy as jnp
from jax import lax
from jax.experimental import pallas as pl
from jax.experimental.pallas import tpu as pltpu

COMPUTE_DTYPE = jnp.bfloat16   # MXU operand dtype; accum / softmax stay f32


def _round_up(x, m):
    return (x + m - 1) // m * m


# ----------------------------------------------------------------------------
# Positional embedding construction (plain JAX glue — parameter/feature setup)
# ----------------------------------------------------------------------------
def get_positional_features_exponential(positions, features, seq_len,
                                        min_half_life=3.0):
    max_range = math.log(seq_len) / math.log(2.0)
    half_life = 2.0 ** jnp.linspace(min_half_life, max_range, features)
    half_life = half_life[None, :]
    pos = jnp.abs(positions)[:, None]
    return jnp.exp(-math.log(2.0) / half_life * pos)


def get_positional_features_central_mask(positions, features, seq_len):
    center_widths = 2.0 ** jnp.arange(1, features + 1, dtype=jnp.float32) - 1.0
    return (center_widths[None, :] > jnp.abs(positions)[:, None]).astype(jnp.float32)


def gamma_pdf(x, concentration, rate):
    log_unnormalized = jax.scipy.special.xlogy(concentration - 1.0, x) - rate * x
    log_normalization = (jax.scipy.special.gammaln(concentration)
                         - concentration * jnp.log(rate))
    return jnp.exp(log_unnormalized - log_normalization)


def get_positional_features_gamma(positions, features, seq_len,
                                  stddev=None, start_mean=None, eps=1e-8):
    if stddev is None:
        stddev = seq_len / (2 * features)
    if start_mean is None:
        start_mean = seq_len / features
    mean = jnp.linspace(start_mean, seq_len, features)[None, :]
    concentration = (mean / stddev) ** 2
    rate = mean / stddev ** 2
    probs = gamma_pdf(jnp.abs(positions.astype(jnp.float32))[:, None],
                      concentration, rate)
    probs = probs + eps
    return probs / jnp.max(probs, axis=-1, keepdims=True)


def get_positional_embed(seq_len, feature_size):
    distances = jnp.arange(-seq_len + 1, seq_len, dtype=jnp.float32)
    feature_functions = [get_positional_features_exponential,
                         get_positional_features_central_mask,
                         get_positional_features_gamma]
    num_components = len(feature_functions) * 2
    assert feature_size % num_components == 0
    num_basis_per_class = feature_size // num_components
    embeddings = [fn(distances, num_basis_per_class, seq_len)
                  for fn in feature_functions]
    embeddings = jnp.concatenate(embeddings, axis=-1)
    embeddings = jnp.concatenate(
        (embeddings, jnp.sign(distances)[:, None] * embeddings), axis=-1)
    return embeddings  # (2*seq_len - 1, feature_size)


# ----------------------------------------------------------------------------
# Tiled linear kernel: y = x @ w + b   (K-accumulating grid, f32 accumulator)
# ----------------------------------------------------------------------------
def _matmul_kernel(x_ref, w_ref, b_ref, o_ref, acc_ref):
    @pl.when(pl.program_id(2) == 0)
    def _():
        acc_ref[...] = jnp.zeros_like(acc_ref)

    acc_ref[...] += jnp.dot(x_ref[...], w_ref[...],
                            preferred_element_type=jnp.float32)

    @pl.when(pl.program_id(2) == pl.num_programs(2) - 1)
    def _():
        o_ref[...] = (acc_ref[...] + b_ref[...]).astype(o_ref.dtype)


def pallas_linear(x, w, b=None, *, out_dtype=jnp.float32,
                  compute_dtype=COMPUTE_DTYPE, tm=256, tn=256, tk=512):
    M, K = x.shape
    K2, N = w.shape
    assert K == K2
    tm = min(tm, _round_up(M, 8))
    tn = min(tn, _round_up(N, 128))
    tk = min(tk, _round_up(K, 128))
    Mp, Np, Kp = _round_up(M, tm), _round_up(N, tn), _round_up(K, tk)

    xp = jnp.pad(x.astype(compute_dtype), ((0, Mp - M), (0, Kp - K)))
    wp = jnp.pad(w.astype(compute_dtype), ((0, Kp - K), (0, Np - N)))
    if b is None:
        bp = jnp.zeros((1, Np), jnp.float32)
    else:
        bp = jnp.pad(b.astype(jnp.float32).reshape(1, N), ((0, 0), (0, Np - N)))

    grid = (Mp // tm, Np // tn, Kp // tk)
    out = pl.pallas_call(
        _matmul_kernel,
        out_shape=jax.ShapeDtypeStruct((Mp, Np), out_dtype),
        grid=grid,
        in_specs=[
            pl.BlockSpec((tm, tk), lambda i, j, kk: (i, kk)),
            pl.BlockSpec((tk, tn), lambda i, j, kk: (kk, j)),
            pl.BlockSpec((1, tn), lambda i, j, kk: (0, j)),
        ],
        out_specs=pl.BlockSpec((tm, tn), lambda i, j, kk: (i, j)),
        scratch_shapes=[pltpu.VMEM((tm, tn), jnp.float32)],
        compiler_params=pltpu.CompilerParams(
            dimension_semantics=("parallel", "parallel", "arbitrary")),
    )(xp, wp, bp)
    return out[:M, :N]


# ----------------------------------------------------------------------------
# Attention core kernel: one query tile, all heads, relative-position logits
# ----------------------------------------------------------------------------
def _attention_core_kernel(q_ref, k_ref, v_ref, rk_ref, cb_ref, pb_ref, o_ref,
                           *, scale, n, tq, w_pad, heads, dim_key, dim_value,
                           compute_dtype):
    dk, dv = dim_key, dim_value
    qi = pl.program_id(1)
    # rel_k row window for this query tile: global rel indices
    # [n - tq - qi*tq, n - tq - qi*tq + w_pad)
    start = n - tq - qi * tq
    if tq % 8 == 0 and n % 8 == 0:
        start = pl.multiple_of(start, 8)

    dn_t = (((1,), (1,)), ((), ()))   # contract last dim of both (A @ B^T)

    for hd in range(heads):
        qf = q_ref[0, :, pl.ds(hd * dk, dk)].astype(jnp.float32) * scale
        q_c = qf.astype(compute_dtype)                                   # (tq, dk)
        k_h = k_ref[0, :, pl.ds(hd * dk, dk)].astype(compute_dtype)      # (n, dk)
        v_h = v_ref[0, :, pl.ds(hd * dv, dv)].astype(compute_dtype)      # (n, dv)
        rk_w = rk_ref[pl.ds(start, w_pad),
                      pl.ds(hd * dk, dk)].astype(compute_dtype)          # (w_pad, dk)
        cb_h = cb_ref[pl.ds(hd, 1), :].astype(compute_dtype)             # (1, dk)
        pb_h = pb_ref[pl.ds(hd, 1), :].astype(compute_dtype)             # (1, dk)

        # Fused logit matmul: q_scaled @ [rel_k_window ; K]^T  -> (tq, w_pad+n)
        rhs = jnp.concatenate([rk_w, k_h], axis=0)                       # (w_pad+n, dk)
        big = lax.dot_general(q_c, rhs, dn_t,
                              preferred_element_type=jnp.float32)
        # rank-1 bias contributions
        rel_bias = lax.dot_general(pb_h, rk_w, dn_t,
                                   preferred_element_type=jnp.float32)   # (1, w_pad)
        cont_bias = lax.dot_general(cb_h, k_h, dn_t,
                                    preferred_element_type=jnp.float32)  # (1, n)

        rel = big[:, :w_pad] + rel_bias        # (tq, w_pad)
        content = big[:, w_pad:] + cont_bias   # (tq, n)

        # relative shift (O(n^2)):  shifted[i, j] = rel[i, j - i + tq - 1]
        # implemented as a per-row lane rotation (XLU) + static slice.
        shifted = pltpu.roll(rel, w_pad - tq + 1, 1,
                             stride=1, stride_axis=0)[:, :n]

        logits = content + shifted
        m = jnp.max(logits, axis=-1, keepdims=True)
        p = jnp.exp(logits - m)
        denom = jnp.sum(p, axis=-1, keepdims=True)
        attn = p * pl.reciprocal(denom, approx=True)

        out_h = lax.dot_general(attn.astype(compute_dtype), v_h,
                                (((1,), (0,)), ((), ())),
                                preferred_element_type=jnp.float32)      # (tq, dv)
        o_ref[0, :, pl.ds(hd * dv, dv)] = out_h.astype(o_ref.dtype)


def attention_core(q, k, v, rel_k, cb, pb, *, scale, n, tq, w_pad,
                   heads, dim_key, dim_value, compute_dtype=COMPUTE_DTYPE):
    """q/k: (b, n, h*dk); v: (b, n, h*dv); rel_k: (r_pad, h*dk); cb/pb: (h, dk).
    Returns (b, n, h*dv) f32 (lane-dense 'b n (h d)' layout)."""
    b = q.shape[0]
    h, dk, dv = heads, dim_key, dim_value
    r_pad = rel_k.shape[0]
    kernel = functools.partial(
        _attention_core_kernel, scale=scale, n=n, tq=tq, w_pad=w_pad,
        heads=h, dim_key=dk, dim_value=dv, compute_dtype=compute_dtype)
    return pl.pallas_call(
        kernel,
        out_shape=jax.ShapeDtypeStruct((b, n, h * dv), jnp.float32),
        grid=(b, n // tq),
        in_specs=[
            pl.BlockSpec((1, tq, h * dk), lambda bi, qi: (bi, qi, 0)),   # q tile
            pl.BlockSpec((1, n, h * dk), lambda bi, qi: (bi, 0, 0)),     # K (resident)
            pl.BlockSpec((1, n, h * dv), lambda bi, qi: (bi, 0, 0)),     # V (resident)
            pl.BlockSpec((r_pad, h * dk), lambda bi, qi: (0, 0)),        # rel_k (resident)
            pl.BlockSpec((h, dk), lambda bi, qi: (0, 0)),                # content bias
            pl.BlockSpec((h, dk), lambda bi, qi: (0, 0)),                # pos bias
        ],
        out_specs=pl.BlockSpec((1, tq, h * dv), lambda bi, qi: (bi, qi, 0)),
        compiler_params=pltpu.CompilerParams(
            dimension_semantics=("parallel", "parallel")),
    )(q, k, v, rel_k, cb, pb)


# ----------------------------------------------------------------------------
# Full forward pass (Pallas path)
# ----------------------------------------------------------------------------
def attention_forward(params, x, *, heads, dim_key, dim_value,
                      num_rel_pos_features, q_block=128,
                      compute_dtype=COMPUTE_DTYPE):
    b, n, dim = x.shape
    h, dk, dv = heads, dim_key, dim_value
    scale = dim_key ** (-0.5)

    # Query tile size.  TODO(synk): pad the query axis for n not divisible by tq.
    tq = n if n <= q_block else q_block
    assert n % tq == 0, "sequence length must be divisible by the query tile"

    # Fused QKV projection (x read once, one wide MXU matmul).
    wqkv = jnp.concatenate([params["wq"], params["wk"], params["wv"]], axis=1)
    x2 = x.reshape(b * n, dim)
    qkv = pallas_linear(x2, wqkv, out_dtype=compute_dtype,
                        compute_dtype=compute_dtype)
    qkv = qkv.reshape(b, n, h * (2 * dk + dv))
    q = qkv[..., :h * dk]                       # (b, n, h*dk) — no transposes
    k = qkv[..., h * dk:2 * h * dk]
    v = qkv[..., 2 * h * dk:]

    # Relative-position keys.  Rows are padded so every query tile can read a
    # lane-aligned (w_pad, dk) window; padded rows are zero and never selected.
    R = 2 * n - 1
    w_pad = _round_up(n + tq - 1, 128)
    r_pad = _round_up((n - tq) + w_pad, 8)
    pos = get_positional_embed(n, num_rel_pos_features)       # (2n-1, F)
    pos = jnp.pad(pos, ((0, r_pad - R), (0, 0)))
    # pos_dropout is identity (eval / p = 0.0)
    rel_k = pallas_linear(pos, params["w_rel_k"], out_dtype=compute_dtype,
                          compute_dtype=compute_dtype)        # (r_pad, h*dk)

    cb = params["rel_content_bias"].reshape(h, dk)
    pb = params["rel_pos_bias"].reshape(h, dk)

    core = attention_core(q, k, v, rel_k, cb, pb, scale=scale, n=n, tq=tq,
                          w_pad=w_pad, heads=h, dim_key=dk, dim_value=dv,
                          compute_dtype=compute_dtype)        # (b, n, h*dv) f32

    # attn_dropout is identity (eval / p = 0.0)
    y = pallas_linear(core.reshape(b * n, h * dv), params["w_out"],
                      params["b_out"], out_dtype=jnp.float32,
                      compute_dtype=compute_dtype)
    return y.reshape(b, n, dim), core


# ----------------------------------------------------------------------------
# Pure-JAX f32 reference (mirrors the PyTorch module) for verification
# ----------------------------------------------------------------------------
def _relative_shift_ref(x):
    b, h, t1, t2 = x.shape
    x = jnp.concatenate((jnp.zeros_like(x[..., :1]), x), axis=-1)
    t2 = t2 + 1
    x = x.reshape(b, h, t2, t1)
    x = x[:, :, 1:, :]
    x = x.reshape(b, h, t1, t2 - 1)
    return x[..., :(t2 + 1) // 2]


def reference_forward(params, x, *, heads, dim_key, dim_value,
                      num_rel_pos_features):
    b, n, dim = x.shape
    h, dk, dv = heads, dim_key, dim_value
    scale = dim_key ** (-0.5)
    hp = lax.Precision.HIGHEST

    def mm(a, bb):
        return jnp.dot(a, bb, precision=hp)

    x2 = x.reshape(b * n, dim)
    q = mm(x2, params["wq"]).reshape(b, n, h, dk).transpose(0, 2, 1, 3)
    k = mm(x2, params["wk"]).reshape(b, n, h, dk).transpose(0, 2, 1, 3)
    v = mm(x2, params["wv"]).reshape(b, n, h, dv).transpose(0, 2, 1, 3)

    q = q * scale
    cb = params["rel_content_bias"]
    pb = params["rel_pos_bias"]
    content = jnp.einsum("bhid,bhjd->bhij", q + cb, k, precision=hp)

    positions = get_positional_embed(n, num_rel_pos_features)
    rel_k = mm(positions, params["w_rel_k"]).reshape(2 * n - 1, h, dk)
    rel_k = rel_k.transpose(1, 0, 2)
    rel = jnp.einsum("bhid,hjd->bhij", q + pb, rel_k, precision=hp)
    rel = _relative_shift_ref(rel)

    attn = jax.nn.softmax(content + rel, axis=-1)
    core = jnp.einsum("bhij,bhjd->bhid", attn, v, precision=hp)
    core_bnd = core.transpose(0, 2, 1, 3).reshape(b, n, h * dv)

    y = mm(core_bnd.reshape(b * n, h * dv), params["w_out"]) + params["b_out"][None, :]
    return y.reshape(b, n, dim), core_bnd


# ----------------------------------------------------------------------------
# Deterministic parameter initialization (shapes from the module's __init__)
# ----------------------------------------------------------------------------
def init_params(key, dim, heads, dim_key, dim_value, num_rel_pos_features):
    def lin(kk, fan_in, fan_out):
        bound = 1.0 / math.sqrt(fan_in)
        # stored as (in, out) = PyTorch weight transposed, so y = x @ W
        return jax.random.uniform(kk, (fan_in, fan_out), minval=-bound,
                                  maxval=bound, dtype=jnp.float32)

    ks = jax.random.split(key, 6)
    return {
        "wq": lin(ks[0], dim, dim_key * heads),
        "wk": lin(ks[1], dim, dim_key * heads),
        "wv": lin(ks[2], dim, dim_value * heads),
        "w_rel_k": lin(ks[3], num_rel_pos_features, dim_key * heads),
        # nn.init.zeros_ on to_out weight & bias
        "w_out": jnp.zeros((dim_value * heads, dim), jnp.float32),
        "b_out": jnp.zeros((dim,), jnp.float32),
        "rel_content_bias": jax.random.normal(ks[4], (1, heads, 1, dim_key),
                                              dtype=jnp.float32),
        "rel_pos_bias": jax.random.normal(ks[5], (1, heads, 1, dim_key),
                                          dtype=jnp.float32),
    }


if __name__ == "__main__":
    B, N, DIM = 2, 16, 32
    HEADS, DK, DV = 2, 16, 16
    NRPF = 12   # must be divisible by 6

    key = jax.random.PRNGKey(0)
    kp, kx = jax.random.split(key)
    params = init_params(kp, DIM, HEADS, DK, DV, NRPF)
    x = jax.random.normal(kx, (B, N, DIM), dtype=jnp.float32)

    y, core = attention_forward(params, x, heads=HEADS, dim_key=DK,
                                dim_value=DV, num_rel_pos_features=NRPF)
    y = jax.block_until_ready(y)
    core = jax.block_until_ready(core)

    y_ref, core_ref = reference_forward(params, x, heads=HEADS, dim_key=DK,
                                        dim_value=DV,
                                        num_rel_pos_features=NRPF)

    # bf16 MXU operands vs. f32 "highest" reference -> relaxed tolerance
    assert jnp.allclose(core, core_ref, atol=5e-2, rtol=5e-2), \
        "attention core mismatch"
    assert jnp.allclose(y, y_ref, atol=1e-4), "output mismatch"

    print("KERNEL_OK")
</pallas_src>

<mosaic_0001>
module attributes {stable_mosaic.version = 11 : i64} {
  func.func @_matmul_kernel(%arg0: i32, %arg1: i32, %arg2: i32, %arg3: memref<32x128xbf16, #tpu.memory_space<vmem>>, %arg4: memref<128x128xbf16, #tpu.memory_space<vmem>>, %arg5: memref<1x128xf32, #tpu.memory_space<vmem>>, %arg6: memref<32x128xbf16, #tpu.memory_space<vmem>>, %arg7: memref<32x128xf32, #tpu.memory_space<vmem>>) attributes {dimension_semantics = [#tpu.dimension_semantics<parallel>, #tpu.dimension_semantics<parallel>, #tpu.dimension_semantics<arbitrary>], iteration_bounds = array<i64: 1, 1, 1>, scalar_prefetch = 0 : i64, scratch_operands = 1 : i64, tpu.core_type = #tpu.core_type<tc>, window_params = [{transform_indices = @transform_0, window_bounds = array<i64: 32, 128>}, {transform_indices = @transform_1, window_bounds = array<i64: 128, 128>}, {transform_indices = @transform_2, window_bounds = array<i64: 1, 128>}, {transform_indices = @transform_3, window_bounds = array<i64: 32, 128>}]} {
    %c0_i32 = arith.constant 0 : i32
    %0 = arith.cmpi eq, %arg2, %c0_i32 : i32
    %1 = arith.extui %0 : i1 to i32
    %c0_i32_0 = arith.constant 0 : i32
    %2 = arith.cmpi ne, %1, %c0_i32_0 : i32
    scf.if %2 {
      %cst_10 = arith.constant 0.000000e+00 : f32
      %12 = vector.broadcast %cst_10 : f32 to vector<32x128xf32>
      %c0_11 = arith.constant 0 : index
      %c0_12 = arith.constant 0 : index
      %13 = vector.load %arg7[%c0_11, %c0_12] : memref<32x128xf32, #tpu.memory_space<vmem>>, vector<32x128xf32>
      tpu.vector_store %arg7[%c0_11, %c0_12], %12 {strides = array<i32>} : memref<32x128xf32, #tpu.memory_space<vmem>>, vector<32x128xf32>,
    } else {
    }
    %c0 = arith.constant 0 : index
    %c0_1 = arith.constant 0 : index
    %3 = vector.load %arg7[%c0, %c0_1] : memref<32x128xf32, #tpu.memory_space<vmem>>, vector<32x128xf32>
    %c0_2 = arith.constant 0 : index
    %c0_3 = arith.constant 0 : index
    %4 = vector.load %arg3[%c0_2, %c0_3] : memref<32x128xbf16, #tpu.memory_space<vmem>>, vector<32x128xbf16>
    %c0_4 = arith.constant 0 : index
    %c0_5 = arith.constant 0 : index
    %5 = vector.load %arg4[%c0_4, %c0_5] : memref<128x128xbf16, #tpu.memory_space<vmem>>, vector<128x128xbf16>
    %cst = arith.constant dense<0.000000e+00> : vector<32x128xf32>
    %6 = tpu.matmul %4, %5, %cst {dimension_numbers = #tpu.dot_dimension_numbers<[1], [0], [0], [1], [0, 0, 1, 1], [], []>} : vector<32x128xbf16>, vector<128x128xbf16>, vector<32x128xf32> -> vector<32x128xf32>
    %7 = arith.addf %3, %6 : vector<32x128xf32>
    %c0_6 = arith.constant 0 : index
    %c0_7 = arith.constant 0 : index
    %8 = vector.load %arg7[%c0_6, %c0_7] : memref<32x128xf32, #tpu.memory_space<vmem>>, vector<32x128xf32>
    tpu.vector_store %arg7[%c0_6, %c0_7], %7 {strides = array<i32>} : memref<32x128xf32, #tpu.memory_space<vmem>>, vector<32x128xf32>,
    %c0_i32_8 = arith.constant 0 : i32
    %9 = arith.cmpi eq, %arg2, %c0_i32_8 : i32
    %10 = arith.extui %9 : i1 to i32
    %c0_i32_9 = arith.constant 0 : i32
    %11 = arith.cmpi ne, %10, %c0_i32_9 : i32
    scf.if %11 {
      %c0_10 = arith.constant 0 : index
      %c0_11 = arith.constant 0 : index
      %12 = vector.load %arg7[%c0_10, %c0_11] : memref<32x128xf32, #tpu.memory_space<vmem>>, vector<32x128xf32>
      %c0_12 = arith.constant 0 : index
      %c0_13 = arith.constant 0 : index
      %13 = vector.load %arg5[%c0_12, %c0_13] : memref<1x128xf32, #tpu.memory_space<vmem>>, vector<1x128xf32>
      %14 = vector.broadcast %13 : vector<1x128xf32> to vector<32x128xf32>
      %15 = arith.addf %12, %14 : vector<32x128xf32>
      %16 = arith.truncf %15 : vector<32x128xf32> to vector<32x128xbf16>
      %c0_14 = arith.constant 0 : index
      %c0_15 = arith.constant 0 : index
      %17 = vector.load %arg6[%c0_14, %c0_15] : memref<32x128xbf16, #tpu.memory_space<vmem>>, vector<32x128xbf16>
      tpu.vector_store %arg6[%c0_14, %c0_15], %16 {strides = array<i32>} : memref<32x128xbf16, #tpu.memory_space<vmem>>, vector<32x128xbf16>,
    } else {
    }
    return
  }
  func.func @transform_0(%arg0: i32, %arg1: i32, %arg2: i32) -> (i32, i32) {
    %c0_i32 = arith.constant 0 : i32
    return %arg0, %arg2 : i32, i32
  }
  func.func @transform_1(%arg0: i32, %arg1: i32, %arg2: i32) -> (i32, i32) {
    %c0_i32 = arith.constant 0 : i32
    return %arg2, %arg1 : i32, i32
  }
  func.func @transform_2(%arg0: i32, %arg1: i32, %arg2: i32) -> (i32, i32) {
    %c0_i32 = arith.constant 0 : i32
    %c0_i32_0 = arith.constant 0 : i32
    return %c0_i32, %arg1 : i32, i32
  }
  func.func @transform_3(%arg0: i32, %arg1: i32, %arg2: i32) -> (i32, i32) {
    %c0_i32 = arith.constant 0 : i32
    return %arg0, %arg1 : i32, i32
  }
}

</mosaic_0001>

<bundles_post_ra>
// kernel: tpu_custom_call.1
= control target key start
LH: loop header
LB: loop body
LE: loop exit
PB: predicated region body
PF: predicated region fallthrough
CT: control target
= control target key end

     0   :  { %8 = vsyncpa [#allocation4], 0  ;;  %s436_s0 = inlined_call_operand.hbm [shape: bf16[32,128], index: 0, kind: input, shape index: {}]   ;;  %s437_s1 = inlined_call_operand.hbm [shape: bf16[128,128], index: 1, kind: input, shape index: {}]   ;;  %s438_s2 = inlined_call_operand.vmem [shape: f32[1,128], index: 2, kind: input, shape index: {}]   ;;  %s439_s3 = inlined_call_operand.hbm [shape: bf16[32,128], index: 3, kind: output, shape index: {}]  }
   0x1   :  { %9 = vsyncpa [#allocation7], 0 }
   0x2   :  { %10 = vsyncpa [#allocation5], 0  ;;  %s390_s12 = smov [#allocation3]  }
   0x3   :  { %s16_s13 = sshll.u32 %s390_s12, 4  ;;  %s17_s13 = int_to_ptr.vmem [resolvable:$true] %s16_s13 }
   0x4   :  { %s332_s14 = scalar_lea.vmem %s17_s13, 256  ;;  %p337_p1 = scmp.lt.s32.totalorder %s17_s13, %s17_s13 }
   0x5   :  { %p333_p0 = scmp.ne.s32.totalorder %s17_s13, %s332_s14  ;;  %p338_p2 = scmp.lt.s32.totalorder %s332_s14, %s332_s14 }
   0x7   :  { %p339_p3 = por %p338_p2, %p337_p1 }
   0x9   :  { %p340_p4 = pnand %p339_p3, %p333_p0 }
   0xb   :  { %343 = shalt.err (!%p340_p4)
}
   0xc   :  { %s391_s15 = smov 64   ;;  %s392_s16 = smov 4  }
   0xd   :  { %22 = dma.hbm_to_vmem [thread:$0]  %s436_s0, 256, %s17_s13, [#allocation4], %s391_s15, %s391_s15, %s392_s16  }
   0xe   :  { %s393_s19 = smov [#allocation6]  }
   0xf   :  { %s28_s20 = sshll.u32 %s393_s19, 4  ;;  %s29_s20 = int_to_ptr.vmem [resolvable:$true] %s28_s20 }
  0x10   :  { %s352_s21 = scalar_lea.vmem %s29_s20, 1024  ;;  %p357_p6 = scmp.lt.s32.totalorder %s29_s20, %s29_s20 }
  0x11   :  { %p353_p5 = scmp.ne.s32.totalorder %s29_s20, %s352_s21  ;;  %p358_p7 = scmp.lt.s32.totalorder %s352_s21, %s352_s21 }
  0x13   :  { %p359_p8 = por %p358_p7, %p357_p6 }
  0x15   :  { %p360_p9 = pnand %p359_p8, %p353_p5 }
  0x17   :  { %363 = shalt.err (!%p360_p9)
}
  0x18   :  { %34 = dma.hbm_to_vmem [thread:$0]  %s437_s1, 1024, %s29_s20, [#allocation7], %s391_s15, %s391_s15, %s392_s16  }
  0x19   :  { %384 = dma.done.wait [#allocation4], 256  }
  0x1a   :  { %385 = vsyncadd [#allocation4], 4294967040 }
  0x1b   :  { %386 = dma.done.wait [#allocation7], 1024  }
  0x1c   :  { %387 = vsyncadd [#allocation7], 4294966272  ;;  %v314_v0 = vld [vmem:[#allocation6 + $0x38] sm:$0xff]   ;;  %v315_v1 = vld [vmem:[#allocation6 + $0x30] sm:$0xff]   ;;  %s394_s24 = smov [#allocation8]  }
  0x1d   :  { %289 = vmatprep.subr.bf16.mxu0 %v314_v0  ;;  %v316_v2 = vld [vmem:[#allocation6 + $0x28] sm:$0xff]   ;;  %v317_v3 = vld [vmem:[#allocation6 + $0x20] sm:$0xff]   ;;  %v322_v4 = vld [vmem:[#allocation3] sm:$0xff]   ;;  %s236_s25 = sshll.u32 %s394_s24, 4  ;;  %s237_s25 = int_to_ptr.vmem [resolvable:$true] %s236_s25 }
  0x1e   :  { %290 = vmatpush3.bf16.msra.mxu0 %v314_v0  ;;  %305 = vmatprep.mubr.bf16.mxu0 %v322_v4  ;;  %v318_v5 = vld [vmem:[#allocation6 + $0x18] sm:$0xff]   ;;  %v319_v6 = vld [vmem:[#allocation6 + $0x10] sm:$0xff]   ;;  %v320_v7 = vld [vmem:[#allocation6 + $0x8] sm:$0xff]   ;;  %s364_s26 = scalar_lea.vmem %s237_s25, 256  ;;  %p369_p11 = scmp.lt.s32.totalorder %s237_s25, %s237_s25 }
  0x1f   :  { %291 = vmatprep.subr.bf16.mxu0 %v315_v1  ;;  %v321_v8 = vld [vmem:[#allocation6] sm:$0xff]   ;;  %v323_v9 = vld [vmem:[#allocation3 + $0x8] sm:$0xff]   ;;  %v259_v11 = vld [vmem:[%s438_s2] ss:$0 sm:$0xff]  ;;  %p365_p10 = scmp.ne.s32.totalorder %s237_s25, %s364_s26  ;;  %p370_p12 = scmp.lt.s32.totalorder %s364_s26, %s364_s26 }
  0x21   :  { %p371_p13 = por %p370_p12, %p369_p11 }
  0x22   :  { %292 = vmatpush3.bf16.msra.mxu0 %v315_v1 }
  0x23   :  { %293 = vmatprep.subr.bf16.mxu0 %v316_v2  ;;  %p372_p0 = pnand %p371_p13, %p365_p10 }
  0x26   :  { %294 = vmatpush3.bf16.msra.mxu0 %v316_v2 }
  0x27   :  { %295 = vmatprep.subr.bf16.mxu0 %v317_v3 }
  0x2a   :  { %296 = vmatpush3.bf16.msra.mxu0 %v317_v3 }
  0x2b   :  { %297 = vmatprep.subr.bf16.mxu0 %v318_v5 }
  0x2e   :  { %298 = vmatpush3.bf16.msra.mxu0 %v318_v5 }
  0x2f   :  { %299 = vmatprep.subr.bf16.mxu0 %v319_v6 }
  0x32   :  { %300 = vmatpush3.bf16.msra.mxu0 %v319_v6 }
  0x33   :  { %301 = vmatprep.subr.bf16.mxu0 %v320_v7 }
  0x36   :  { %302 = vmatpush3.bf16.msra.mxu0 %v320_v7 }
  0x37   :  { %303 = vmatprep.subr.bf16.mxu0 %v321_v8 }
  0x3a   :  { %304 = vmatpush3.bf16.msra.mxu0 %v321_v8 }
  0x3d   :  { %306 = vmatmul.mubr.bf16.vlgmr.msra.gmra.mxu0 %v323_v9 }
  0xfd   :  { %v307_v10 = vpop.f32.mrf.mxu0 }
  0xfe   :  { %v209_v14 = vadd.f32 %v307_v10, %v259_v11 }
  0xff   :  { %v170_v12 = vpop.f32.mrf.mxu0 }
 0x100   :  { %v207_v17 = vadd.f32 %v259_v11, %v170_v12 }
 0x101   :  { %v308_v13 = vpop.f32.mrf.mxu0 }
 0x102   :  { %v210_v15 = vadd.f32 %v308_v13, %v259_v11 }
 0x103   :  { %v173_v16 = vpop.f32.mrf.mxu0 }
 0x104   :  { %v276_v18 = vpack.c.bf16 %v210_v15, %v209_v14  ;;  %v208_v19 = vadd.f32 %v259_v11, %v173_v16 }
 0x106   :  { %278 = vst [vmem:[#allocation8 + $0x8] sm:$0xff] %v276_v18   ;;  %v271_v20 = vpack.c.bf16 %v208_v19, %v207_v17 }
 0x108   :  { %272 = vst [vmem:[#allocation8] sm:$0xff] %v271_v20  }
 0x109   :  { %375 = shalt.err (!%p372_p0)
}
 0x10a   :  { %242 = dma.vmem_to_hbm [thread:$0]  %s237_s25, 256, %s439_s3, [#allocation5], %s391_s15, %s391_s15, %s392_s16  }
 0x10b   :  { %388 = dma.done.wait [#allocation5], 256  }
 0x10c   :  { %389 = vsyncadd [#allocation5], 4294967040 }
 0x10d   :  { %246 = vsyncpa [#allocation4], 1 }
 0x10e   :  { %247 = vsyncpa [#allocation7], 1 }
 0x10f   :  { %248 = vsyncpa [#allocation5], 1 }

</bundles_post_ra>
